<compile_context>
chip_gen: v7x
topology: tpu7x:2x2x1
jax: 0.10.0
libtpu: 0.0.40
codegen_flags: <defaults>
</compile_context>

<pallas_src>
import functools
import math

import jax
import jax.numpy as jnp
from jax.experimental import pallas as pl
from jax.experimental.pallas import tpu as pltpu


def _round_up(x, m):
    return ((x + m - 1) // m) * m


def _weighted_mse_kernel(w_ref, out_ref, tgt_ref, partial_ref, acc_ref, *,
                         rows_total, tile_rows, chunk, lanes, need_mask,
                         weight_is_row):
    """Per-block lane-wise partial sums of w * (output - target)^2.

    w_ref:       (1, L) or (tile_rows, L) f32 importance-weight lane pattern
    out_ref:     (tile_rows, L)   model-output tile
    tgt_ref:     (tile_rows, L)   target tile
    partial_ref: (1, 1, L) f32    partial sums for this grid block
    acc_ref:     (chunk, L) f32   VMEM accumulator scratch
    """
    n_chunks = tile_rows // chunk
    block_row0 = pl.program_id(0) * tile_rows

    def chunk_value(row_start, w_chunk):
        o = out_ref[pl.ds(row_start, chunk), :].astype(jnp.float32)
        t = tgt_ref[pl.ds(row_start, chunk), :].astype(jnp.float32)
        d = o - t
        v = w_chunk * (d * d)                       # pure VPU streaming
        if need_mask:
            # Ragged last block: rows past `rows_total` hold garbage -> zero
            # them with a select (safe even if the garbage is NaN/Inf).
            gid = (block_row0 + row_start
                   + jax.lax.broadcasted_iota(jnp.int32, (chunk, lanes), 0))
            v = jnp.where(gid < rows_total, v, 0.0)
        return v

    if n_chunks == 1:
        partial_ref[0] = jnp.sum(chunk_value(0, w_ref[...]),
                                 axis=0, keepdims=True)
    else:
        acc_ref[...] = jnp.zeros_like(acc_ref)

        def body(c, carry):
            start = pl.multiple_of(c * chunk, chunk)
            if weight_is_row:
                w_chunk = w_ref[...]                       # (1, L) broadcast
            else:
                w_chunk = w_ref[pl.ds(start, chunk), :]    # periodic weights
            acc_ref[...] += chunk_value(start, w_chunk)
            return carry

        jax.lax.fori_loop(0, n_chunks, body, 0, unroll=(n_chunks <= 8))
        partial_ref[0] = jnp.sum(acc_ref[...], axis=0, keepdims=True)


def weighted_mse_loss(output, target, importance_base, *, tile_rows=None):
    """Pallas implementation of WeightedMSELoss.forward.

    output, target: (B, F) arrays of the same shape/dtype.
    Returns a scalar of the same dtype as `output`.
    """
    assert output.shape == target.shape and output.ndim == 2
    B, F = output.shape
    dtype = output.dtype
    itemsize = jnp.dtype(dtype).itemsize
    lanes = 128

    # ---- importance weights (f32; cumprod keeps integer-exponent semantics
    # exact for negative bases, unlike float pow).  `importance_base` is a
    # static Python scalar in the torch module, so the Python branch is fine.
    if importance_base == 0:
        w = jnp.zeros((F,), jnp.float32).at[0].set(1.0)
    else:
        w = jnp.cumprod(jnp.concatenate(
            [jnp.ones((1,), jnp.float32),
             jnp.full((F - 1,), importance_base, jnp.float32)]))

    # ---- Layout: lane-dense whenever possible (no padding copies). ---------
    if F % lanes == 0:
        rows, L = B, F
        data_o, data_t = output, target
        w_period, P = w.reshape(1, F), 1
    elif (B * F) % lanes == 0:
        # Free reshape of the contiguous (B, F) buffer into rows of 128 lanes.
        rows, L = (B * F) // lanes, lanes
        data_o = output.reshape(rows, lanes)
        data_t = target.reshape(rows, lanes)
        period = math.lcm(F, lanes)            # flat-index period (elements)
        P = period // lanes                    # ... in rows of 128 lanes
        w_period = jnp.tile(w, period // F).reshape(P, lanes)
    else:
        # TODO(synk): lane-sparse fallback when B*F is not a multiple of 128
        # (flattening would need an HBM-copying pad); correct but lane-masked.
        rows, L = B, F
        data_o, data_t = output, target
        w_period, P = w.reshape(1, F), 1

    # ---- Tile sizing: generation-aware VMEM budget, ~4 MiB/input/buffer. ---
    sub = max(8, 32 // itemsize)               # sublane pack: 8 f32 / 16 bf16
    align = (sub * P) // math.gcd(sub, P)      # lcm(sub, P)
    # ~128 KiB (f32) of work per inner chunk keeps live vregs bounded.
    chunk = max(align, ((128 * 1024) // (L * 4)) // align * align)

    try:
        phys_vmem = pltpu.get_tpu_info().vmem_capacity_bytes
    except Exception:
        phys_vmem = 64 * 1024 * 1024           # conservative (v7x) fallback
    vmem_ceiling = min(96 * 1024 * 1024, (phys_vmem * 3) // 4)

    if tile_rows is None:
        per_row = 2 * 3 * L * itemsize         # 2 streamed inputs x 3 buffers
        if P > 1:
            per_row += 2 * L * 4               # resident periodic weight tile
        budget = (vmem_ceiling * 3) // 4       # headroom for scratch/outputs
        cap = max(chunk, (budget // per_row) // chunk * chunk)
        target_rows = max(chunk,
                          ((4 * 1024 * 1024) // (L * itemsize)) // chunk * chunk)
        tile_rows = min(cap, target_rows)
        # Keep >= 2 blocks so the "parallel" axis spans both v7x TensorCores.
        tile_rows = min(tile_rows, _round_up(pl.cdiv(rows, 2), chunk))
        if tile_rows >= rows:
            tile_rows, chunk = rows, rows      # single exact block
    else:
        tile_rows = max(align, (tile_rows // align) * align)
        if tile_rows >= rows:
            tile_rows = rows
        chunk = tile_rows                      # no inner chunking for overrides

    num_blocks = pl.cdiv(rows, tile_rows)
    need_mask = (rows % tile_rows) != 0

    # ---- Weight operand (DMA'd once via constant index_map). ---------------
    if P == 1:
        w_arr, w_block, weight_is_row = w_period, (1, L), True
    else:
        w_arr = jnp.tile(w_period, (pl.cdiv(tile_rows, P), 1))[:tile_rows]
        w_block, weight_is_row = (tile_rows, L), False

    kernel = functools.partial(
        _weighted_mse_kernel,
        rows_total=rows, tile_rows=tile_rows, chunk=chunk, lanes=L,
        need_mask=need_mask, weight_is_row=weight_is_row)

    stream_kwargs = {"pipeline_mode": pl.Buffered(3)} if num_blocks >= 3 else {}

    partials = pl.pallas_call(
        kernel,
        out_shape=jax.ShapeDtypeStruct((num_blocks, 1, L), jnp.float32),
        grid_spec=pltpu.PrefetchScalarGridSpec(
            num_scalar_prefetch=0,
            grid=(num_blocks,),
            in_specs=[
                pl.BlockSpec(w_block, lambda i: (0, 0)),                 # weights
                pl.BlockSpec((tile_rows, L), lambda i: (i, 0), **stream_kwargs),
                pl.BlockSpec((tile_rows, L), lambda i: (i, 0), **stream_kwargs),
            ],
            out_specs=pl.BlockSpec((1, 1, L), lambda i: (i, 0, 0)),
            scratch_shapes=[pltpu.VMEM((chunk, L), jnp.float32)],
        ),
        compiler_params=pltpu.CompilerParams(
            # Independent per-block partials -> megacore sharding on v7x.
            dimension_semantics=("parallel",),
            vmem_limit_bytes=int(vmem_ceiling),
        ),
    )(w_arr, data_o, data_t)

    # Single cross-lane + cross-block reduction outside the hot loop.
    return jnp.sum(partials).astype(dtype)


if __name__ == "__main__":
    key = jax.random.PRNGKey(0)
    k1, k2, k3, k4, k5, k6 = jax.random.split(key, 6)

    def ref_loss(o, t, base):
        f = o.shape[1]
        if base == 0:
            wr = jnp.zeros((f,), jnp.float32).at[0].set(1.0)
        else:
            wr = jnp.cumprod(jnp.concatenate(
                [jnp.ones((1,), jnp.float32),
                 jnp.full((f - 1,), base, jnp.float32)]))
        of, tf = o.astype(jnp.float32), t.astype(jnp.float32)
        return jnp.sum(wr[None, :] * (of - tf) ** 2)

    # Case 1: demo shape (lane-dense flatten, single exact block).
    out = jax.random.normal(k1, (16, 32), dtype=jnp.float32)
    tgt = jax.random.normal(k2, (16, 32), dtype=jnp.float32)
    loss = jax.block_until_ready(weighted_mse_loss(out, tgt, 0.7))
    assert jnp.allclose(loss, ref_loss(out, tgt, 0.7), rtol=1e-5, atol=1e-5), loss

    # Case 2: importance_base == 0 branch.
    loss0 = jax.block_until_ready(weighted_mse_loss(out, tgt, 0))
    assert jnp.allclose(loss0, ref_loss(out, tgt, 0), rtol=1e-5, atol=1e-5), loss0

    # Case 3: forced small tile -> multiple blocks, ragged last block masked
    # in-kernel (no padding copies), Buffered(3) pipeline exercised.
    out2 = jax.random.normal(k3, (100, 32), dtype=jnp.float32)
    tgt2 = jax.random.normal(k4, (100, 32), dtype=jnp.float32)
    loss2 = jax.block_until_ready(weighted_mse_loss(out2, tgt2, 0.9, tile_rows=8))
    assert jnp.allclose(loss2, ref_loss(out2, tgt2, 0.9), rtol=1e-4, atol=1e-4), loss2

    # Case 4: F=24 (neither multiple nor divisor of 128) but B*F % 128 == 0 ->
    # lane-dense flatten with periodic weight tile, multi-block, in-kernel
    # chunk loop and ragged-block mask.
    out3 = jax.random.normal(k5, (4096, 24), dtype=jnp.float32)
    tgt3 = jax.random.normal(k6, (4096, 24), dtype=jnp.float32)
    loss3 = jax.block_until_ready(weighted_mse_loss(out3, tgt3, 0.95))
    assert jnp.allclose(loss3, ref_loss(out3, tgt3, 0.95), rtol=1e-4, atol=1e-2), loss3

    # Case 5: B*F not a multiple of 128 -> lane-sparse fallback path.
    out4 = jax.random.normal(k1, (24, 24), dtype=jnp.float32)
    tgt4 = jax.random.normal(k2, (24, 24), dtype=jnp.float32)
    loss4 = jax.block_until_ready(weighted_mse_loss(out4, tgt4, 0.5))
    assert jnp.allclose(loss4, ref_loss(out4, tgt4, 0.5), rtol=1e-5, atol=1e-5), loss4

    # Case 6: bf16 inputs (f32 accumulation inside the kernel).
    out5 = jax.random.normal(k3, (256, 32), dtype=jnp.bfloat16)
    tgt5 = jax.random.normal(k4, (256, 32), dtype=jnp.bfloat16)
    loss5 = jax.block_until_ready(weighted_mse_loss(out5, tgt5, 0.8))
    assert jnp.allclose(jnp.float32(loss5), ref_loss(out5, tgt5, 0.8),
                        rtol=1e-2, atol=1e-2), loss5

    print("KERNEL_OK")
</pallas_src>

<mosaic_0001>
module attributes {stable_mosaic.version = 11 : i64} {
  func.func @_weighted_mse_kernel(%arg0: i32, %arg1: memref<1x128xf32, #tpu.memory_space<vmem>>, %arg2: memref<4x128xf32, #tpu.memory_space<vmem>>, %arg3: memref<4x128xf32, #tpu.memory_space<vmem>>, %arg4: memref<1x1x128xf32, #tpu.memory_space<vmem>>, %arg5: memref<4x128xf32, #tpu.memory_space<vmem>>) attributes {dimension_semantics = [#tpu.dimension_semantics<parallel>], iteration_bounds = array<i64: 1>, scalar_prefetch = 0 : i64, scratch_operands = 1 : i64, tpu.core_type = #tpu.core_type<tc>, window_params = [{pipeline_mode = #tpu.pipeline_mode<synchronous>, transform_indices = @transform_0, window_bounds = array<i64: 1, 128>}, {transform_indices = @transform_1, window_bounds = array<i64: 4, 128>}, {transform_indices = @transform_2, window_bounds = array<i64: 4, 128>}, {transform_indices = @transform_3, window_bounds = array<i64: 1, 1, 128>}]} {
    %c0 = arith.constant 0 : index
    %c0_0 = arith.constant 0 : index
    %0 = vector.load %arg1[%c0, %c0_0] : memref<1x128xf32, #tpu.memory_space<vmem>>, vector<1x128xf32>
    %c0_1 = arith.constant 0 : index
    %c0_2 = arith.constant 0 : index
    %1 = vector.load %arg2[%c0_1, %c0_2] : memref<4x128xf32, #tpu.memory_space<vmem>>, vector<4x128xf32>
    %c0_3 = arith.constant 0 : index
    %c0_4 = arith.constant 0 : index
    %2 = vector.load %arg3[%c0_3, %c0_4] : memref<4x128xf32, #tpu.memory_space<vmem>>, vector<4x128xf32>
    %3 = arith.subf %1, %2 : vector<4x128xf32>
    %4 = arith.mulf %3, %3 : vector<4x128xf32>
    %5 = vector.broadcast %0 : vector<1x128xf32> to vector<4x128xf32>
    %6 = arith.mulf %5, %4 : vector<4x128xf32>
    %cst = arith.constant dense<0.000000e+00> : vector<128xf32>
    %7 = vector.multi_reduction <add>, %6, %cst [0] : vector<4x128xf32> to vector<128xf32>
    %8 = vector.shape_cast %7 : vector<128xf32> to vector<1x128xf32>
    %c0_5 = arith.constant 0 : index
    %c0_6 = arith.constant 0 : index
    %c0_7 = arith.constant 0 : index
    %9 = vector.load %arg4[%c0_5, %c0_6, %c0_7] : memref<1x1x128xf32, #tpu.memory_space<vmem>>, vector<1x1x128xf32>
    %10 = vector.shape_cast %9 : vector<1x1x128xf32> to vector<1x128xf32>
    %11 = vector.shape_cast %8 : vector<1x128xf32> to vector<1x1x128xf32>
    tpu.vector_store %arg4[%c0_5, %c0_6, %c0_7], %11 {strides = array<i32>} : memref<1x1x128xf32, #tpu.memory_space<vmem>>, vector<1x1x128xf32>,
    return
  }
  func.func @transform_0(%arg0: i32) -> (i32, i32) {
    %c0_i32 = arith.constant 0 : i32
    %c0_i32_0 = arith.constant 0 : i32
    %c0_i32_1 = arith.constant 0 : i32
    return %c0_i32, %c0_i32_0 : i32, i32
  }
  func.func @transform_1(%arg0: i32) -> (i32, i32) {
    %c0_i32 = arith.constant 0 : i32
    %c0_i32_0 = arith.constant 0 : i32
    return %arg0, %c0_i32 : i32, i32
  }
  func.func @transform_2(%arg0: i32) -> (i32, i32) {
    %c0_i32 = arith.constant 0 : i32
    %c0_i32_0 = arith.constant 0 : i32
    return %arg0, %c0_i32 : i32, i32
  }
  func.func @transform_3(%arg0: i32) -> (i32, i32, i32) {
    %c0_i32 = arith.constant 0 : i32
    %c0_i32_0 = arith.constant 0 : i32
    %c0_i32_1 = arith.constant 0 : i32
    return %arg0, %c0_i32, %c0_i32_0 : i32, i32, i32
  }
}

</mosaic_0001>

<bundles_post_ra>
// kernel: tpu_custom_call.1
= control target key start
LH: loop header
LB: loop body
LE: loop exit
PB: predicated region body
PF: predicated region fallthrough
CT: control target
= control target key end

     0   :  { %8 = vsyncpa [#allocation4], 0  ;;  %s214_s0 = inlined_call_operand.hbm [shape: f32[1,128], index: 0, kind: input, shape index: {}]   ;;  %s215_s1 = inlined_call_operand.hbm [shape: f32[4,128], index: 1, kind: input, shape index: {}]   ;;  %s216_s2 = inlined_call_operand.vmem [shape: f32[4,128], index: 2, kind: input, shape index: {}]   ;;  %s217_s3 = inlined_call_operand.hbm [shape: f32[1,1,128], index: 3, kind: output, shape index: {}]  }
   0x1   :  { %9 = vsyncpa [#allocation7], 0 }
   0x2   :  { %10 = vsyncpa [#allocation5], 0  ;;  %s152_s12 = smov [#allocation3]   ;;  %s153_s14 = smov [#allocation6]  }
   0x3   :  { %s17_s13 = sshll.u32 %s152_s12, 4  ;;  %s27_s15 = sshll.u32 %s153_s14, 4  ;;  %s18_s13 = int_to_ptr.vmem [resolvable:$true] %s17_s13  ;;  %s28_s15 = int_to_ptr.vmem [resolvable:$true] %s27_s15 }
   0x4   :  { %s80_s18 = scalar_lea.hbm %s214_s0, 16 }
   0x5   :  { %p81_p0 = scmp.ne.s32.totalorder %s214_s0, %s80_s18  ;;  %p84_p1 = scmp.lt.u32.totalorder %s80_s18, %s214_s0 }
   0x7   :  { %p86_p2 = pnand %p84_p1, %p81_p0 }
   0x9   :  { %89 = shalt.err (!%p86_p2)
}
   0xa   :  { %s90_s23 = scalar_lea.vmem %s18_s13, 16  ;;  %s94_s24 = scalar_lea.vmem %s18_s13, 32 }
   0xb   :  { %p91_p3 = scmp.ne.s32.totalorder %s18_s13, %s90_s23  ;;  %p95_p4 = scmp.lt.s32.totalorder %s18_s13, %s18_s13 }
   0xc   :  { %p96_p5 = scmp.lt.s32.totalorder %s94_s24, %s90_s23 }
   0xe   :  { %p97_p6 = por %p96_p5, %p95_p4 }
  0x10   :  { %p98_p7 = pnand %p97_p6, %p91_p3 }
  0x12   :  { %101 = shalt.err (!%p98_p7)
}
  0x13   :  { %20 = dma.hbm_to_vmem [thread:$0]  %s214_s0, 16, %s18_s13, [#allocation4]  }
  0x14   :  { %s102_s29 = scalar_lea.hbm %s215_s1, 64 }
  0x15   :  { %p103_p8 = scmp.ne.s32.totalorder %s215_s1, %s102_s29  ;;  %p106_p9 = scmp.lt.u32.totalorder %s102_s29, %s215_s1 }
  0x17   :  { %p108_p10 = pnand %p106_p9, %p103_p8 }
  0x19   :  { %111 = shalt.err (!%p108_p10)
}
  0x1a   :  { %s112_s7 = scalar_lea.vmem %s28_s15, 64  ;;  %p117_p12 = scmp.lt.s32.totalorder %s28_s15, %s28_s15 }
  0x1b   :  { %p113_p11 = scmp.ne.s32.totalorder %s28_s15, %s112_s7  ;;  %p118_p13 = scmp.lt.s32.totalorder %s112_s7, %s112_s7 }
  0x1d   :  { %p119_p0 = por %p118_p13, %p117_p12 }
  0x1f   :  { %p120_p1 = pnand %p119_p0, %p113_p11 }
  0x21   :  { %123 = shalt.err (!%p120_p1)
}
  0x22   :  { %30 = dma.hbm_to_vmem [thread:$0]  %s215_s1, 64, %s28_s15, [#allocation7]  }
  0x23   :  { %146 = dma.done.wait [#allocation4], 16  }
  0x24   :  { %147 = vsyncadd [#allocation4], 4294967280 }
  0x25   :  { %148 = dma.done.wait [#allocation7], 64  }
  0x26   :  { %149 = vsyncadd [#allocation7], 4294967232  ;;  %v40_v0 = vld [vmem:[#allocation6] sm:$0xf]  ;;  %v41_v1 = vld [vmem:[%s216_s2] sm:$0xf] }
  0x27   :  { %v42_v2 = vsub.f32 %v40_v0, %v41_v1  ;;  %v76_v3 = vld [vmem:[#allocation3] ss:$0 sm:$0xff]  ;;  %vm51_vm0 = vcmask 1043456   ;;  %s154_s1 = smov [#allocation8]  }
  0x28   :  { %s66_s11 = sshll.u32 %s154_s1, 4  ;;  %s67_s11 = int_to_ptr.vmem [resolvable:$true] %s66_s11 }
  0x29   :  { %v43_v4 = vmul.f32 %v42_v2, %v42_v2  ;;  %s124_s12 = scalar_lea.vmem %s67_s11, 16  ;;  %s128_s13 = scalar_lea.vmem %s67_s11, 32 }
  0x2a   :  { %p125_p2 = scmp.ne.s32.totalorder %s67_s11, %s124_s12  ;;  %p129_p3 = scmp.lt.s32.totalorder %s67_s11, %s67_s11 }
  0x2b   :  { %v50_v5 = vmul.f32 %v76_v3, %v43_v4  ;;  %p130_p4 = scmp.lt.s32.totalorder %s128_s13, %s124_s12 }
  0x2d   :  { %v52_v6 = vsel %vm51_vm0, %v50_v5, 0.0  ;;  %p131_p5 = por %p130_p4, %p129_p3 }
  0x2e   :  { %v53_v7 = vrot.slane %v52_v6, 4 }
  0x2f   :  { %p132_p6 = pnand %p131_p5, %p125_p2 }
  0x30   :  { %v54_v8 = vadd.f32 %v53_v7, %v52_v6 }
  0x32   :  { %v55_v9 = vrot.slane %v54_v8, 2 }
  0x34   :  { %v56_v10 = vadd.f32 %v55_v9, %v54_v8 }
  0x36   :  { %v57_v11 = vrot.slane %v56_v10, 1 }
  0x38   :  { %v58_v12 = vadd.f32 %v57_v11, %v56_v10 }
  0x3a   :  { %59 = vst [vmem:[#allocation8] sm:$0x1] %v58_v12 }
  0x3b   :  { %135 = shalt.err (!%p132_p6)
}
  0x3c   :  { %s136_s15 = scalar_lea.hbm %s217_s3, 16 }
  0x3d   :  { %p137_p7 = scmp.ne.s32.totalorder %s217_s3, %s136_s15  ;;  %p140_p8 = scmp.lt.u32.totalorder %s136_s15, %s217_s3 }
  0x3f   :  { %p142_p9 = pnand %p140_p8, %p137_p7 }
  0x41   :  { %145 = shalt.err (!%p142_p9)
}
  0x42   :  { %69 = dma.vmem_to_hbm [thread:$0]  %s67_s11, 16, %s217_s3, [#allocation5]  }
  0x43   :  { %150 = dma.done.wait [#allocation5], 16  }
  0x44   :  { %151 = vsyncadd [#allocation5], 4294967280 }
  0x45   :  { %73 = vsyncpa [#allocation4], 1 }
  0x46   :  { %74 = vsyncpa [#allocation7], 1 }
  0x47   :  { %75 = vsyncpa [#allocation5], 1 }

</bundles_post_ra>
